<compile_context>
chip_gen: v7x
topology: tpu7x:2x2x1
jax: 0.10.0
libtpu: 0.0.40
codegen_flags: <defaults>
</compile_context>

<pallas_src>
import jax
import jax.numpy as jnp
from jax.experimental import pallas as pl
from jax.experimental.pallas import tpu as pltpu


def _round_up(x, m):
    return ((x + m - 1) // m) * m


def number_network_kernel(x_ref, w1_ref, b1_ref, w2_ref, b2_ref, o_ref):
    # hidden = sigmoid(x @ W1 + b1).  x arrives as f32 straight from HBM; cast
    # to bf16 here so the MXU sees bf16 operands with f32 accumulation and the
    # wrapper never materializes a second copy of x.
    x = x_ref[...].astype(jnp.bfloat16)
    h = jnp.dot(x, w1_ref[...], preferred_element_type=jnp.float32)
    h = h + b1_ref[...]                       # b1 [1, 256] broadcasts over rows
    # sigmoid(z) = 0.5 * (tanh(z/2) + 1): tanh goes to the EUP slot.
    h = 0.5 * (jnp.tanh(0.5 * h) + 1.0)

    # logits = h @ W2 + b2 over the lane-padded (128-wide) class axis.
    logits = jnp.dot(h.astype(w2_ref.dtype), w2_ref[...],
                     preferred_element_type=jnp.float32)
    logits = logits + b2_ref[...]             # pad columns carry a -1e30 bias

    # Numerically stable softmax; pad classes contribute exp(-1e30) == 0 (f32).
    m = jnp.max(logits, axis=1, keepdims=True)
    e = jnp.exp(logits - m)
    denom = jnp.sum(e, axis=1, keepdims=True)
    o_ref[...] = (e * pl.reciprocal(denom, approx=True)).astype(o_ref.dtype)


def _choose_batch_tile(B, block_b):
    """Rows per grid step.

    * multiple of 16 (bf16 output packs 2 rows/sublane); tiny batches just use
      the 8-rounded full batch (block == full array dim is always legal).
    * >= 2 grid steps when the batch allows it, so the "parallel" grid axis
      actually shards across v7x's two TensorCores (v5e/v6e: 1 TC, harmless).
    * multiple of 128 for large tiles so the MXU M dimension stays full
      (matters most on v5e, which sits near the compute roofline here).
    """
    if B <= 16:
        return _round_up(B, 8)
    tb = min(block_b, _round_up(pl.cdiv(B, 2), 16))
    if tb >= 256:
        tb = (tb // 128) * 128
    return max(tb, 16)


def number_network(x, w1, b1, w2, b2, *, block_b=1024):
    """softmax(sigmoid(x @ w1 + b1) @ w2 + b2); w1/w2 stored as [in, out]."""
    B, F_in = x.shape
    H = w1.shape[1]
    C = w2.shape[1]
    C_pad = _round_up(max(C, 128), 128)

    TB = _choose_batch_tile(B, block_b)
    Bp = _round_up(B, TB)

    # x stays f32 and is only touched if batch padding is required.
    xf = x.astype(jnp.float32)
    if Bp != B:
        xf = jnp.pad(xf, ((0, Bp - B), (0, 0)))

    # Weights stream as bf16 (halves weight DMA); biases stay f32.
    w1b = w1.astype(jnp.bfloat16)
    b1f = b1.astype(jnp.float32)
    # Lane-pad the 10-wide output layer to 128: zero weights, -1e30 bias so the
    # padded classes get exactly zero softmax mass.
    w2b = jnp.zeros((H, C_pad), jnp.bfloat16).at[:, :C].set(w2.astype(jnp.bfloat16))
    b2f = jnp.full((1, C_pad), -1e30, jnp.float32).at[:, :C].set(b2.astype(jnp.float32))

    flops = 2 * Bp * (F_in * H + H * C_pad)
    bytes_accessed = (xf.size * 4 + w1b.size * 2 + w2b.size * 2
                      + b1f.size * 4 + b2f.size * 4 + Bp * C_pad * 2)

    out = pl.pallas_call(
        number_network_kernel,
        out_shape=jax.ShapeDtypeStruct((Bp, C_pad), jnp.bfloat16),
        grid_spec=pltpu.PrefetchScalarGridSpec(
            num_scalar_prefetch=0,
            grid=(Bp // TB,),
            in_specs=[
                pl.BlockSpec((TB, F_in), lambda i: (i, 0)),    # x tile per step (f32)
                pl.BlockSpec((F_in, H), lambda i: (0, 0)),     # W1 resident
                pl.BlockSpec((1, H), lambda i: (0, 0)),        # b1 resident
                pl.BlockSpec((H, C_pad), lambda i: (0, 0)),    # W2 resident
                pl.BlockSpec((1, C_pad), lambda i: (0, 0)),    # b2 resident
            ],
            out_specs=pl.BlockSpec((TB, C_pad), lambda i: (i, 0)),
        ),
        compiler_params=pltpu.CompilerParams(
            dimension_semantics=("parallel",),   # megacore sharding on v7x
        ),
        cost_estimate=pl.CostEstimate(
            flops=flops,
            transcendentals=Bp * (H + C_pad + 1),
            bytes_accessed=bytes_accessed,
        ),
    )(xf, w1b, b1f, w2b, b2f)

    # Strip batch padding and lane-padded fake classes; upcast to f32 to match
    # the original PyTorch module's output dtype.
    return out[:B, :C].astype(jnp.float32)


def init_params(key):
    # Deterministic init mirroring nn.Linear's U(-1/sqrt(fan_in), 1/sqrt(fan_in)).
    k1, k2, k3, k4 = jax.random.split(key, 4)
    in1, out1 = 784, 256
    in2, out2 = 256, 10
    bound1 = 1.0 / jnp.sqrt(in1)
    bound2 = 1.0 / jnp.sqrt(in2)
    # stored as [in, out] (i.e. W^T relative to PyTorch's [out, in])
    w1 = jax.random.uniform(k1, (in1, out1), jnp.float32, -bound1, bound1)
    b1 = jax.random.uniform(k2, (1, out1), jnp.float32, -bound1, bound1)
    w2 = jax.random.uniform(k3, (in2, out2), jnp.float32, -bound2, bound2)
    b2 = jax.random.uniform(k4, (1, out2), jnp.float32, -bound2, bound2)
    return w1, b1, w2, b2


if __name__ == "__main__":
    key = jax.random.PRNGKey(0)
    kx, kp = jax.random.split(key)

    B = 8
    x = jax.random.normal(kx, (B, 784), jnp.float32)
    w1, b1, w2, b2 = init_params(kp)

    out = jax.block_until_ready(number_network(x, w1, b1, w2, b2))

    # Pure-f32 reference with PyTorch semantics. The kernel streams bf16
    # weights, computes in bf16/f32 on the MXU, and writes bf16 probabilities,
    # so compare with tolerances that cover bf16 rounding (~2^-9 relative).
    h_ref = jax.nn.sigmoid(x @ w1 + b1)
    ref = jax.nn.softmax(h_ref @ w2 + b2, axis=1)

    assert out.shape == (B, 10)
    # bf16 output quantization + approx reciprocal => rows sum to 1 within ~5e-3.
    assert bool(jnp.all(jnp.abs(jnp.sum(out, axis=1) - 1.0) < 5e-3)), "rows not normalized"
    assert bool(jnp.max(jnp.abs(out - ref)) < 1e-2), "mismatch vs reference"

    print("KERNEL_OK")
</pallas_src>

<mosaic_0001>
module attributes {stable_mosaic.version = 11 : i64} {
  func.func @number_network_kernel(%arg0: i32, %arg1: memref<8x784xf32, #tpu.memory_space<vmem>>, %arg2: memref<784x256xbf16, #tpu.memory_space<vmem>>, %arg3: memref<1x256xf32, #tpu.memory_space<vmem>>, %arg4: memref<256x128xbf16, #tpu.memory_space<vmem>>, %arg5: memref<1x128xf32, #tpu.memory_space<vmem>>, %arg6: memref<8x128xbf16, #tpu.memory_space<vmem>>) attributes {dimension_semantics = [#tpu.dimension_semantics<parallel>], iteration_bounds = array<i64: 1>, scalar_prefetch = 0 : i64, scratch_operands = 0 : i64, tpu.core_type = #tpu.core_type<tc>, window_params = [{transform_indices = @transform_0, window_bounds = array<i64: 8, 784>}, {pipeline_mode = #tpu.pipeline_mode<synchronous>, transform_indices = @transform_1, window_bounds = array<i64: 784, 256>}, {pipeline_mode = #tpu.pipeline_mode<synchronous>, transform_indices = @transform_2, window_bounds = array<i64: 1, 256>}, {pipeline_mode = #tpu.pipeline_mode<synchronous>, transform_indices = @transform_3, window_bounds = array<i64: 256, 128>}, {pipeline_mode = #tpu.pipeline_mode<synchronous>, transform_indices = @transform_4, window_bounds = array<i64: 1, 128>}, {transform_indices = @transform_5, window_bounds = array<i64: 8, 128>}]} {
    %c0 = arith.constant 0 : index
    %c0_0 = arith.constant 0 : index
    %0 = vector.load %arg1[%c0, %c0_0] : memref<8x784xf32, #tpu.memory_space<vmem>>, vector<8x784xf32>
    %1 = arith.truncf %0 : vector<8x784xf32> to vector<8x784xbf16>
    %c0_1 = arith.constant 0 : index
    %c0_2 = arith.constant 0 : index
    %2 = vector.load %arg2[%c0_1, %c0_2] : memref<784x256xbf16, #tpu.memory_space<vmem>>, vector<784x256xbf16>
    %cst = arith.constant dense<0.000000e+00> : vector<8x256xf32>
    %3 = tpu.matmul %1, %2, %cst {dimension_numbers = #tpu.dot_dimension_numbers<[1], [0], [0], [1], [0, 0, 1, 1], [], []>} : vector<8x784xbf16>, vector<784x256xbf16>, vector<8x256xf32> -> vector<8x256xf32>
    %c0_3 = arith.constant 0 : index
    %c0_4 = arith.constant 0 : index
    %4 = vector.load %arg3[%c0_3, %c0_4] : memref<1x256xf32, #tpu.memory_space<vmem>>, vector<1x256xf32>
    %5 = vector.broadcast %4 : vector<1x256xf32> to vector<8x256xf32>
    %6 = arith.addf %3, %5 : vector<8x256xf32>
    %cst_5 = arith.constant 5.000000e-01 : f32
    %7 = vector.broadcast %cst_5 : f32 to vector<8x256xf32>
    %8 = arith.mulf %7, %6 : vector<8x256xf32>
    %9 = math.tanh %8 : vector<8x256xf32>
    %cst_6 = arith.constant 1.000000e+00 : f32
    %10 = vector.broadcast %cst_6 : f32 to vector<8x256xf32>
    %11 = arith.addf %9, %10 : vector<8x256xf32>
    %cst_7 = arith.constant 5.000000e-01 : f32
    %12 = vector.broadcast %cst_7 : f32 to vector<8x256xf32>
    %13 = arith.mulf %12, %11 : vector<8x256xf32>
    %14 = arith.truncf %13 : vector<8x256xf32> to vector<8x256xbf16>
    %c0_8 = arith.constant 0 : index
    %c0_9 = arith.constant 0 : index
    %15 = vector.load %arg4[%c0_8, %c0_9] : memref<256x128xbf16, #tpu.memory_space<vmem>>, vector<256x128xbf16>
    %cst_10 = arith.constant dense<0.000000e+00> : vector<8x128xf32>
    %16 = tpu.matmul %14, %15, %cst_10 {dimension_numbers = #tpu.dot_dimension_numbers<[1], [0], [0], [1], [0, 0, 1, 1], [], []>} : vector<8x256xbf16>, vector<256x128xbf16>, vector<8x128xf32> -> vector<8x128xf32>
    %c0_11 = arith.constant 0 : index
    %c0_12 = arith.constant 0 : index
    %17 = vector.load %arg5[%c0_11, %c0_12] : memref<1x128xf32, #tpu.memory_space<vmem>>, vector<1x128xf32>
    %18 = vector.broadcast %17 : vector<1x128xf32> to vector<8x128xf32>
    %19 = arith.addf %16, %18 : vector<8x128xf32>
    %cst_13 = arith.constant dense<0xFF800000> : vector<8xf32>
    %20 = vector.multi_reduction <maximumf>, %19, %cst_13 [1] : vector<8x128xf32> to vector<8xf32>
    %21 = vector.shape_cast %20 : vector<8xf32> to vector<8x1xf32>
    %22 = vector.broadcast %21 : vector<8x1xf32> to vector<8x128xf32>
    %23 = arith.subf %19, %22 : vector<8x128xf32>
    %24 = math.exp %23 : vector<8x128xf32>
    %cst_14 = arith.constant dense<0.000000e+00> : vector<8xf32>
    %25 = vector.multi_reduction <add>, %24, %cst_14 [1] : vector<8x128xf32> to vector<8xf32>
    %26 = vector.shape_cast %25 : vector<8xf32> to vector<8x1xf32>
    %27 = tpu.reciprocal %26 {approx = true} : vector<8x1xf32> -> vector<8x1xf32>
    %28 = vector.broadcast %27 : vector<8x1xf32> to vector<8x128xf32>
    %29 = arith.mulf %24, %28 : vector<8x128xf32>
    %30 = arith.truncf %29 : vector<8x128xf32> to vector<8x128xbf16>
    %c0_15 = arith.constant 0 : index
    %c0_16 = arith.constant 0 : index
    %31 = vector.load %arg6[%c0_15, %c0_16] : memref<8x128xbf16, #tpu.memory_space<vmem>>, vector<8x128xbf16>
    tpu.vector_store %arg6[%c0_15, %c0_16], %30 {strides = array<i32>} : memref<8x128xbf16, #tpu.memory_space<vmem>>, vector<8x128xbf16>,
    return
  }
  func.func @transform_0(%arg0: i32) -> (i32, i32) {
    %c0_i32 = arith.constant 0 : i32
    %c0_i32_0 = arith.constant 0 : i32
    return %arg0, %c0_i32 : i32, i32
  }
  func.func @transform_1(%arg0: i32) -> (i32, i32) {
    %c0_i32 = arith.constant 0 : i32
    %c0_i32_0 = arith.constant 0 : i32
    %c0_i32_1 = arith.constant 0 : i32
    return %c0_i32, %c0_i32_0 : i32, i32
  }
  func.func @transform_2(%arg0: i32) -> (i32, i32) {
    %c0_i32 = arith.constant 0 : i32
    %c0_i32_0 = arith.constant 0 : i32
    %c0_i32_1 = arith.constant 0 : i32
    return %c0_i32, %c0_i32_0 : i32, i32
  }
  func.func @transform_3(%arg0: i32) -> (i32, i32) {
    %c0_i32 = arith.constant 0 : i32
    %c0_i32_0 = arith.constant 0 : i32
    %c0_i32_1 = arith.constant 0 : i32
    return %c0_i32, %c0_i32_0 : i32, i32
  }
  func.func @transform_4(%arg0: i32) -> (i32, i32) {
    %c0_i32 = arith.constant 0 : i32
    %c0_i32_0 = arith.constant 0 : i32
    %c0_i32_1 = arith.constant 0 : i32
    return %c0_i32, %c0_i32_0 : i32, i32
  }
  func.func @transform_5(%arg0: i32) -> (i32, i32) {
    %c0_i32 = arith.constant 0 : i32
    %c0_i32_0 = arith.constant 0 : i32
    return %arg0, %c0_i32 : i32, i32
  }
}

</mosaic_0001>

<bundles_post_ra>
// kernel: tpu_custom_call.1
= control target key start
LH: loop header
LB: loop body
LE: loop exit
PB: predicated region body
PF: predicated region fallthrough
CT: control target
= control target key end

     0   :  { %10 = vsyncpa [#allocation3], 0  ;;  %s1570_s0 = inlined_call_operand.hbm [shape: f32[8,784], index: 0, kind: input, shape index: {}]   ;;  %s1571_s1 = inlined_call_operand.hbm [shape: bf16[784,256], index: 1, kind: input, shape index: {}]   ;;  %s1572_s2 = inlined_call_operand.vmem [shape: f32[1,256], index: 2, kind: input, shape index: {}]   ;;  %s1573_s3 = inlined_call_operand.hbm [shape: bf16[256,128], index: 3, kind: input, shape index: {}]   ;;  %s1574_s4 = inlined_call_operand.vmem [shape: f32[1,128], index: 4, kind: input, shape index: {}]   ;;  %s1575_s5 = inlined_call_operand.hbm [shape: bf16[8,128], index: 5, kind: output, shape index: {}]  }
   0x1   :  { %11 = vsyncpa [#allocation6], 0 }
   0x2   :  { %12 = vsyncpa [#allocation4], 0  ;;  %s1477_s18 = smov [#allocation5]   ;;  %s1383_s22 = scalar_lea.hbm %s1571_s1, 12544 }
   0x3   :  { %s28_s19 = sshll.u32 %s1477_s18, 4  ;;  %p1384_p0 = scmp.ne.s32.totalorder %s1571_s1, %s1383_s22  ;;  %s29_s19 = int_to_ptr.vmem [resolvable:$true] %s28_s19 }
   0x4   :  { %p1387_p1 = scmp.lt.u32.totalorder %s1383_s22, %s1571_s1 }
   0x6   :  { %p1389_p2 = pnand %p1387_p1, %p1384_p0 }
   0x8   :  { %1392 = shalt.err (!%p1389_p2)
}
   0x9   :  { %s1393_s27 = scalar_lea.vmem %s29_s19, 12544  ;;  %p1398_p4 = scmp.lt.s32.totalorder %s29_s19, %s29_s19 }
   0xa   :  { %p1394_p3 = scmp.ne.s32.totalorder %s29_s19, %s1393_s27  ;;  %p1399_p5 = scmp.lt.s32.totalorder %s1393_s27, %s1393_s27 }
   0xc   :  { %p1400_p6 = por %p1399_p5, %p1398_p4 }
   0xe   :  { %p1401_p7 = pnand %p1400_p6, %p1394_p3 }
  0x10   :  { %1404 = shalt.err (!%p1401_p7)
}
  0x11   :  { %s1478_s28 = smov 128   ;;  %s1479_s29 = smov 8  }
  0x12   :  { %34 = dma.hbm_to_vmem [thread:$0]  %s1571_s1, 12544, %s29_s19, [#allocation6], %s1478_s28, %s1478_s28, %s1479_s29  }
  0x13   :  { %s1480_s7 = smov [#allocation2]   ;;  %s1481_s9 = smov [#allocation7]  }
  0x14   :  { %s19_s8 = sshll.u32 %s1480_s7, 4  ;;  %s42_s10 = sshll.u32 %s1481_s9, 4  ;;  %s20_s8 = int_to_ptr.vmem [resolvable:$true] %s19_s8  ;;  %s43_s10 = int_to_ptr.vmem [resolvable:$true] %s42_s10 }
  0x15   :  { %s1405_s13 = scalar_lea.hbm %s1570_s0, 896 }
  0x16   :  { %p1406_p8 = scmp.ne.s32.totalorder %s1570_s0, %s1405_s13  ;;  %p1409_p9 = scmp.lt.u32.totalorder %s1405_s13, %s1570_s0 }
  0x18   :  { %p1411_p10 = pnand %p1409_p9, %p1406_p8 }
  0x1a   :  { %1414 = shalt.err (!%p1411_p10)
}
  0x1b   :  { %s1415_s1 = scalar_lea.vmem %s20_s8, 896  ;;  %p1420_p12 = scmp.lt.s32.totalorder %s20_s8, %s20_s8 }
  0x1c   :  { %p1416_p11 = scmp.ne.s32.totalorder %s20_s8, %s1415_s1  ;;  %p1421_p13 = scmp.lt.s32.totalorder %s1415_s1, %s1415_s1 }
  0x1e   :  { %p1422_p0 = por %p1421_p13, %p1420_p12 }
  0x20   :  { %p1423_p1 = pnand %p1422_p0, %p1416_p11 }
  0x22   :  { %1426 = shalt.err (!%p1423_p1)
}
  0x23   :  { %22 = dma.hbm_to_vmem [thread:$0]  %s1570_s0, 896, %s20_s8, [#allocation3]  }
  0x24   :  { %s1427_s22 = scalar_lea.hbm %s1573_s3, 2048 }
  0x25   :  { %p1428_p2 = scmp.ne.s32.totalorder %s1573_s3, %s1427_s22  ;;  %p1431_p3 = scmp.lt.u32.totalorder %s1427_s22, %s1573_s3 }
  0x27   :  { %p1433_p4 = pnand %p1431_p3, %p1428_p2 }
  0x29   :  { %1436 = shalt.err (!%p1433_p4)
}
  0x2a   :  { %s1437_s27 = scalar_lea.vmem %s43_s10, 2048  ;;  %p1442_p6 = scmp.lt.s32.totalorder %s43_s10, %s43_s10 }
  0x2b   :  { %p1438_p5 = scmp.ne.s32.totalorder %s43_s10, %s1437_s27  ;;  %p1443_p7 = scmp.lt.s32.totalorder %s1437_s27, %s1437_s27 }
  0x2d   :  { %p1444_p8 = por %p1443_p7, %p1442_p6 }
  0x2f   :  { %p1445_p9 = pnand %p1444_p8, %p1438_p5 }
  0x31   :  { %1448 = shalt.err (!%p1445_p9)
}
  0x32   :  { %s1482_s0 = smov 64   ;;  %s1483_s28 = smov 4  }
  0x33   :  { %48 = dma.hbm_to_vmem [thread:$0]  %s1573_s3, 2048, %s43_s10, [#allocation6], %s1482_s0, %s1482_s0, %s1483_s28  }
  0x34   :  { %1471 = dma.done.wait [#allocation3], 896  }
  0x35   :  { %1472 = vsyncadd [#allocation3], 4294966400 }
  0x36   :  { %1473 = dma.done.wait [#allocation6], 14592  }
  0x37   :  { %1474 = vsyncadd [#allocation6], 4294952704  ;;  %v1212_v0 = vld [vmem:[#allocation5 + $0x104] ss:$8 sps:$4 sm:$0xff]   ;;  %v1214_v1 = vld [vmem:[#allocation5 + $0x100] ss:$8 sps:$4 sm:$0xff]  }
  0x38   :  { %720 = vmatprep.subr.bf16.mxu0 %v1212_v0  ;;  %v1215_v2 = vld [vmem:[#allocation5 + $0x114] ss:$8 sps:$4 sm:$0xff]   ;;  %v1217_v3 = vld [vmem:[#allocation5 + $0x110] ss:$8 sps:$4 sm:$0xff]   ;;  %v1218_v4 = vld [vmem:[#allocation5 + $0x124] ss:$8 sps:$4 sm:$0xff]  }
  0x39   :  { %721 = vmatpush1.bf16.msra.mxu0 %v1214_v1  ;;  %v1220_v5 = vld [vmem:[#allocation5 + $0x120] ss:$8 sps:$4 sm:$0xff]   ;;  %v1221_v6 = vld [vmem:[#allocation5 + $0x134] ss:$8 sps:$4 sm:$0xff]   ;;  %v1223_v7 = vld [vmem:[#allocation5 + $0x130] ss:$8 sps:$4 sm:$0xff]  }
  0x3a   :  { %722 = vmatprep.subr.bf16.mxu0 %v1215_v2  ;;  %v1224_v8 = vld [vmem:[#allocation5 + $0x144] ss:$8 sps:$4 sm:$0xff]   ;;  %v1226_v9 = vld [vmem:[#allocation5 + $0x140] ss:$8 sps:$4 sm:$0xff]   ;;  %v1227_v10 = vld [vmem:[#allocation5 + $0x154] ss:$8 sps:$4 sm:$0xff]  }
  0x3b   :  { %v1229_v11 = vld [vmem:[#allocation5 + $0x150] ss:$8 sps:$4 sm:$0xff]   ;;  %v1254_v12 = vld [vmem:[#allocation5 + $0x4] ss:$8 sps:$4 sm:$0xff]   ;;  %v1256_v13 = vld [vmem:[#allocation5] ss:$8 sps:$4 sm:$0xff]  }
  0x3c   :  { %v1230_v14 = vld [vmem:[#allocation5 + $0x164] ss:$8 sps:$4 sm:$0xff]   ;;  %679 = vmatprep.subr.bf16.mxu1 %v1254_v12  ;;  %v1260_v15 = vld [vmem:[#allocation5 + $0x14] ss:$8 sps:$4 sm:$0xff]   ;;  %v1262_v16 = vld [vmem:[#allocation5 + $0x10] ss:$8 sps:$4 sm:$0xff]  }
  0x3d   :  { %723 = vmatpush1.bf16.msra.mxu0 %v1217_v3  ;;  %680 = vmatpush1.bf16.msra.mxu1 %v1256_v13  ;;  %v1232_v17 = vld [vmem:[#allocation5 + $0x160] ss:$8 sps:$4 sm:$0xff]   ;;  %v1233_v18 = vld [vmem:[#allocation5 + $0x174] ss:$8 sps:$4 sm:$0xff]   ;;  %v1266_v19 = vld [vmem:[#allocation5 + $0x24] ss:$8 sps:$4 sm:$0xff]  }
  0x3e   :  { %724 = vmatprep.subr.bf16.mxu0 %v1218_v4  ;;  %681 = vmatprep.subr.bf16.mxu1 %v1260_v15  ;;  %v64_v20 = vld [vmem:[#allocation2 + $0x18] sm:$0xff]  ;;  %v1235_v23 = vld [vmem:[#allocation5 + $0x170] ss:$8 sps:$4 sm:$0xff]   ;;  %v1272_v25 = vld [vmem:[#allocation5 + $0x34] ss:$8 sps:$4 sm:$0xff]   ;;  %vm675_vm0 = vcmask 130048  }
  0x3f   :  { %v1268_v21 = vld [vmem:[#allocation5 + $0x20] ss:$8 sps:$4 sm:$0xff]   ;;  %v71_v22 = vpack.c.bf16 %v64_v20, %v64_v20  ;;  %v1236_v24 = vld [vmem:[#allocation5 + $0x184] ss:$8 sps:$4 sm:$0xff]   ;;  %v1274_v27 = vld [vmem:[#allocation5 + $0x30] ss:$8 sps:$4 sm:$0xff]  }
  0x40   :  { %v1238_v26 = vld [vmem:[#allocation5 + $0x180] ss:$8 sps:$4 sm:$0xff]   ;;  %v1278_v28 = vld [vmem:[#allocation5 + $0x44] ss:$8 sps:$4 sm:$0xff]   ;;  %v1239_v29 = vld [vmem:[#allocation5 + $0x194] ss:$8 sps:$4 sm:$0xff]  }
  0x41   :  { %725 = vmatpush1.bf16.msra.mxu0 %v1220_v5  ;;  %682 = vmatpush1.bf16.msra.mxu1 %v1262_v16  ;;  %v1241_v30 = vld [vmem:[#allocation5 + $0x190] ss:$8 sps:$4 sm:$0xff]   ;;  %v1280_v31 = vld [vmem:[#allocation5 + $0x40] ss:$8 sps:$4 sm:$0xff]   ;;  %v1284_v32 = vld [vmem:[#allocation5 + $0x54] ss:$8 sps:$4 sm:$0xff]  }
  0x42   :  { %726 = vmatprep.subr.bf16.mxu0 %v1221_v6  ;;  %683 = vmatprep.subr.bf16.mxu1 %v1266_v19  ;;  %v1242_v33 = vld [vmem:[#allocation5 + $0x1a4] ss:$8 sps:$4 sm:$0xff]   ;;  %v1244_v34 = vld [vmem:[#allocation5 + $0x1a0] ss:$8 sps:$4 sm:$0xff]   ;;  %v1286_v35 = vld [vmem:[#allocation5 + $0x50] ss:$8 sps:$4 sm:$0xff]  }
  0x43   :  { %752 = vmatprep.mubr.bf16.mxu0 %v71_v22  ;;  %v1290_v36 = vld [vmem:[#allocation5 + $0x64] ss:$8 sps:$4 sm:$0xff]   ;;  %v1245_v37 = vld [vmem:[#allocation5 + $0x1b4] ss:$8 sps:$4 sm:$0xff]   ;;  %v1247_v38 = vld [vmem:[#allocation5 + $0x1b0] ss:$8 sps:$4 sm:$0xff]  }
  0x44   :  { %v1292_v39 = vld [vmem:[#allocation5 + $0x60] ss:$8 sps:$4 sm:$0xff]   ;;  %v1296_v40 = vld [vmem:[#allocation5 + $0x74] ss:$8 sps:$4 sm:$0xff]   ;;  %v1248_v41 = vld [vmem:[#allocation5 + $0x1c4] ss:$8 sps:$4 sm:$0xff]  }
  0x45   :  { %727 = vmatpush1.bf16.msra.mxu0 %v1223_v7  ;;  %684 = vmatpush1.bf16.msra.mxu1 %v1268_v21  ;;  %v1250_v42 = vld [vmem:[#allocation5 + $0x1c0] ss:$8 sps:$4 sm:$0xff]   ;;  %v1298_v43 = vld [vmem:[#allocation5 + $0x70] ss:$8 sps:$4 sm:$0xff]   ;;  %v1302_v44 = vld [vmem:[#allocation5 + $0x84] ss:$8 sps:$4 sm:$0xff]  }
  0x46   :  { %728 = vmatprep.subr.bf16.mxu0 %v1224_v8  ;;  %685 = vmatprep.subr.bf16.mxu1 %v1272_v25  ;;  %v1251_v45 = vld [vmem:[#allocation5 + $0x1d4] ss:$8 sps:$4 sm:$0xff]   ;;  %v1253_v46 = vld [vmem:[#allocation5 + $0x1d0] ss:$8 sps:$4 sm:$0xff]   ;;  %v1304_v47 = vld [vmem:[#allocation5 + $0x80] ss:$8 sps:$4 sm:$0xff]  }
  0x47   :  { %v1308_v48 = vld [vmem:[#allocation5 + $0x94] ss:$8 sps:$4 sm:$0xff]   ;;  %v1257_v49 = vld [vmem:[#allocation5 + $0x1e4] ss:$8 sps:$4 sm:$0xff]   ;;  %v1259_v50 = vld [vmem:[#allocation5 + $0x1e0] ss:$8 sps:$4 sm:$0xff]  }
  0x48   :  { %v1310_v51 = vld [vmem:[#allocation5 + $0x90] ss:$8 sps:$4 sm:$0xff]   ;;  %v1314_v52 = vld [vmem:[#allocation5 + $0xa4] ss:$8 sps:$4 sm:$0xff]   ;;  %v1263_v53 = vld [vmem:[#allocation5 + $0x1f4] ss:$8 sps:$4 sm:$0xff]  }
  0x49   :  { %729 = vmatpush1.bf16.msra.mxu0 %v1226_v9  ;;  %686 = vmatpush1.bf16.msra.mxu1 %v1274_v27  ;;  %v1265_v54 = vld [vmem:[#allocation5 + $0x1f0] ss:$8 sps:$4 sm:$0xff]   ;;  %v1316_v56 = vld [vmem:[#allocation5 + $0xa0] ss:$8 sps:$4 sm:$0xff]   ;;  %v1320_v57 = vld [vmem:[#allocation5 + $0xb4] ss:$8 sps:$4 sm:$0xff]  }
  0x4a   :  { %730 = vmatprep.subr.bf16.mxu0 %v1227_v10  ;;  %687 = vmatprep.subr.bf16.mxu1 %v1278_v28  ;;  %v63_v55 = vld [vmem:[#allocation2 + $0x10] sm:$0xff]  ;;  %v1271_v58 = vld [vmem:[#allocation5 + $0x204] ss:$8 sps:$4 sm:$0xff]   ;;  %v62_v61 = vld [vmem:[#allocation2 + $0x8] sm:$0xff]  ;;  %v1484_v25 = vmov 0   ;;  %s1485_s8 = smov [#allocation8]  }
  0x4b   :  { %v70_v59 = vpack.c.bf16 %v63_v55, %v63_v55  ;;  %v1322_v60 = vld [vmem:[#allocation5 + $0xb0] ss:$8 sps:$4 sm:$0xff]   ;;  %v1269_v62 = vld [vmem:[#allocation5 + $0x200] ss:$8 sps:$4 sm:$0xff]   ;;  %v1326_v63 = vld [vmem:[#allocation5 + $0xc4] ss:$8 sps:$4 sm:$0xff]   ;;  %v69_v0 = vpack.c.bf16 %v62_v61, %v62_v61 }
  0x4c   :  { %v1277_v1 = vld [vmem:[#allocation5 + $0x214] ss:$8 sps:$4 sm:$0xff]   ;;  %v1328_v2 = vld [vmem:[#allocation5 + $0xc0] ss:$8 sps:$4 sm:$0xff]   ;;  %v1275_v4 = vld [vmem:[#allocation5 + $0x210] ss:$8 sps:$4 sm:$0xff]  }
  0x4d   :  { %731 = vmatpush1.bf16.msra.mxu0 %v1229_v11  ;;  %688 = vmatpush1.bf16.msra.mxu1 %v1280_v31  ;;  %v66_v3 = vld [vmem:[#allocation2 + $0x28] sm:$0xff]  ;;  %v1283_v5 = vld [vmem:[#allocation5 + $0x224] ss:$8 sps:$4 sm:$0xff]   ;;  %v1281_v9 = vld [vmem:[#allocation5 + $0x220] ss:$8 sps:$4 sm:$0xff]   ;;  %s1045_s9 = sshll.u32 %s1485_s8, 4  ;;  %s1046_s9 = int_to_ptr.vmem [resolvable:$true] %s1045_s9 }
  0x4e   :  { %732 = vmatprep.subr.bf16.mxu0 %v1230_v14  ;;  %689 = vmatprep.subr.bf16.mxu1 %v1284_v32  ;;  %v1332_v6 = vld [vmem:[#allocation5 + $0xd4] ss:$8 sps:$4 sm:$0xff]   ;;  %v73_v7 = vpack.c.bf16 %v66_v3, %v66_v3  ;;  %v1334_v8 = vld [vmem:[#allocation5 + $0xd0] ss:$8 sps:$4 sm:$0xff]   ;;  %v1338_v10 = vld [vmem:[#allocation5 + $0xe4] ss:$8 sps:$4 sm:$0xff]   ;;  %p1454_p11 = scmp.lt.s32.totalorder %s1046_s9, %s1046_s9 }
  0x4f   :  { %711 = vmatprep.mubr.bf16.mxu1 %v69_v0  ;;  %v1289_v11 = vld [vmem:[#allocation5 + $0x234] ss:$8 sps:$4 sm:$0xff]   ;;  %v1340_v12 = vld [vmem:[#allocation5 + $0xe0] ss:$8 sps:$4 sm:$0xff]   ;;  %v1287_v13 = vld [vmem:[#allocation5 + $0x230] ss:$8 sps:$4 sm:$0xff]  }
  0x50   :  { %v1344_v14 = vld [vmem:[#allocation5 + $0xf4] ss:$8 sps:$4 sm:$0xff]   ;;  %v1295_v15 = vld [vmem:[#allocation5 + $0x244] ss:$8 sps:$4 sm:$0xff]   ;;  %v1346_v16 = vld [vmem:[#allocation5 + $0xf0] ss:$8 sps:$4 sm:$0xff]  }
  0x51   :  { %733 = vmatpush1.bf16.msra.mxu0 %v1232_v17  ;;  %690 = vmatpush1.bf16.msra.mxu1 %v1286_v35  ;;  %v61_v17 = vld [vmem:[#allocation2] sm:$0xff]  ;;  %v1301_v20 = vld [vmem:[#allocation5 + $0x254] ss:$8 sps:$4 sm:$0xff]   ;;  %v1371_v61 = vld [vmem:[#allocation7 + $0x70] sm:$0xff]  }
  0x52   :  { %734 = vmatprep.subr.bf16.mxu0 %v1233_v18  ;;  %691 = vmatprep.subr.bf16.mxu1 %v1290_v36  ;;  %v1293_v18 = vld [vmem:[#allocation5 + $0x240] ss:$8 sps:$4 sm:$0xff]   ;;  %v1355_v19 = vld [vmem:[#allocation5 + $0x304] ss:$8 sps:$4 sm:$0xff]   ;;  %v68_v21 = vpack.c.bf16 %v61_v17, %v61_v17  ;;  %v1313_v28 = vld [vmem:[#allocation5 + $0x274] ss:$8 sps:$4 sm:$0xff]  }
  0x53   :  { %v1353_v22 = vld [vmem:[#allocation5 + $0x300] ss:$8 sps:$4 sm:$0xff]   ;;  %v1319_v31 = vld [vmem:[#allocation5 + $0x284] ss:$8 sps:$4 sm:$0xff]  }
  0x54   :  { %v1305_v27 = vld [vmem:[#allocation5 + $0x260] ss:$8 sps:$4 sm:$0xff]   ;;  %v1331_v35 = vld [vmem:[#allocation5 + $0x2a4] ss:$8 sps:$4 sm:$0xff]  }
  0x55   :  { %735 = vmatpush1.bf16.msra.mxu0 %v1235_v23  ;;  %692 = vmatpush1.bf16.msra.mxu1 %v1292_v39  ;;  %v1299_v23 = vld [vmem:[#allocation5 + $0x250] ss:$8 sps:$4 sm:$0xff]   ;;  %v1317_v32 = vld [vmem:[#allocation5 + $0x280] ss:$8 sps:$4 sm:$0xff]   ;;  %v1343_v39 = vld [vmem:[#allocation5 + $0x2c4] ss:$8 sps:$4 sm:$0xff]  }
  0x56   :  { %736 = vmatprep.subr.bf16.mxu0 %v1236_v24  ;;  %693 = vmatprep.subr.bf16.mxu1 %v1296_v40  ;;  %v1307_v24 = vld [vmem:[#allocation5 + $0x264] ss:$8 sps:$4 sm:$0xff]   ;;  %v1329_v36 = vld [vmem:[#allocation5 + $0x2a0] ss:$8 sps:$4 sm:$0xff]  }
  0x57   :  { %v1341_v40 = vld [vmem:[#allocation5 + $0x2c0] ss:$8 sps:$4 sm:$0xff]  }
  0x58   :  { %v1365_v55 = vld [vmem:[#allocation7 + $0x58] sm:$0xff]  }
  0x59   :  { %737 = vmatpush1.bf16.msra.mxu0 %v1238_v26  ;;  %694 = vmatpush1.bf16.msra.mxu1 %v1298_v43  ;;  %v67_v26 = vld [vmem:[#allocation2 + $0x30] sm:$0xff]  ;;  %v1352_v43 = vld [vmem:[#allocation5 + $0x2e4] ss:$8 sps:$4 sm:$0xff]  }
  0x5a   :  { %738 = vmatprep.subr.bf16.mxu0 %v1239_v29  ;;  %695 = vmatprep.subr.bf16.mxu1 %v1302_v44  ;;  %v74_v29 = vpack.c.bf16 %v67_v26, %v67_v26  ;;  %v1350_v44 = vld [vmem:[#allocation5 + $0x2e0] ss:$8 sps:$4 sm:$0xff]  }
  0x5b   :  { %v1374_v0 = vld [vmem:[#allocation7 + $0x38] sm:$0xff]  }
  0x5d   :  { %739 = vmatpush1.bf16.msra.mxu0 %v1241_v30  ;;  %696 = vmatpush1.bf16.msra.mxu1 %v1304_v47  ;;  %v1311_v30 = vld [vmem:[#allocation5 + $0x270] ss:$8 sps:$4 sm:$0xff]   ;;  %v65_v47 = vld [vmem:[#allocation2 + $0x20] sm:$0xff] }
  0x5e   :  { %740 = vmatprep.subr.bf16.mxu0 %v1242_v33  ;;  %697 = vmatprep.subr.bf16.mxu1 %v1308_v48  ;;  %v1325_v33 = vld [vmem:[#allocation5 + $0x294] ss:$8 sps:$4 sm:$0xff]   ;;  %v72_v48 = vpack.c.bf16 %v65_v47, %v65_v47 }
  0x61   :  { %741 = vmatpush1.bf16.msra.mxu0 %v1244_v34  ;;  %698 = vmatpush1.bf16.msra.mxu1 %v1310_v51  ;;  %v1323_v34 = vld [vmem:[#allocation5 + $0x290] ss:$8 sps:$4 sm:$0xff]  }
  0x62   :  { %742 = vmatprep.subr.bf16.mxu0 %v1245_v37  ;;  %699 = vmatprep.subr.bf16.mxu1 %v1314_v52  ;;  %v1337_v37 = vld [vmem:[#allocation5 + $0x2b4] ss:$8 sps:$4 sm:$0xff]  }
  0x63   :  { %v1361_v51 = vld [vmem:[#allocation7 + $0x48] sm:$0xff]  }
  0x64   :  { %v1362_v52 = vld [vmem:[#allocation7 + $0x8] sm:$0xff]  }
  0x65   :  { %743 = vmatpush1.bf16.msra.mxu0 %v1247_v38  ;;  %700 = vmatpush1.bf16.msra.mxu1 %v1316_v56  ;;  %v1335_v38 = vld [vmem:[#allocation5 + $0x2b0] ss:$8 sps:$4 sm:$0xff]   ;;  %v1366_v56 = vld [vmem:[#allocation7 + $0x18] sm:$0xff]  }
  0x66   :  { %744 = vmatprep.subr.bf16.mxu0 %v1248_v41  ;;  %701 = vmatprep.subr.bf16.mxu1 %v1320_v57  ;;  %v1349_v41 = vld [vmem:[#allocation5 + $0x2d4] ss:$8 sps:$4 sm:$0xff]  }
  0x67   :  { %v1367_v57 = vld [vmem:[#allocation7 + $0x60] sm:$0xff]  }
  0x69   :  { %745 = vmatpush1.bf16.msra.mxu0 %v1250_v42  ;;  %702 = vmatpush1.bf16.msra.mxu1 %v1322_v60  ;;  %v1347_v42 = vld [vmem:[#allocation5 + $0x2d0] ss:$8 sps:$4 sm:$0xff]  }
  0x6a   :  { %746 = vmatprep.subr.bf16.mxu0 %v1251_v45  ;;  %703 = vmatprep.subr.bf16.mxu1 %v1326_v63  ;;  %v1358_v45 = vld [vmem:[#allocation5 + $0x2f4] ss:$8 sps:$4 sm:$0xff]   ;;  %v1373_v63 = vld [vmem:[#allocation7 + $0x78] sm:$0xff]  }
  0x6b   :  { %v1370_v60 = vld [vmem:[#allocation7 + $0x28] sm:$0xff]  }
  0x6d   :  { %747 = vmatpush1.bf16.msra.mxu0 %v1253_v46  ;;  %704 = vmatpush1.bf16.msra.mxu1 %v1328_v2  ;;  %v1356_v46 = vld [vmem:[#allocation5 + $0x2f0] ss:$8 sps:$4 sm:$0xff]  }
  0x6e   :  { %748 = vmatprep.subr.bf16.mxu0 %v1257_v49  ;;  %705 = vmatprep.subr.bf16.mxu1 %v1332_v6  ;;  %v1359_v49 = vld [vmem:[#allocation7 + $0x40] sm:$0xff]  }
  0x71   :  { %749 = vmatpush1.bf16.msra.mxu0 %v1259_v50  ;;  %706 = vmatpush1.bf16.msra.mxu1 %v1334_v8  ;;  %v1360_v50 = vld [vmem:[#allocation7] sm:$0xff]  }
  0x72   :  { %750 = vmatprep.subr.bf16.mxu0 %v1263_v53  ;;  %707 = vmatprep.subr.bf16.mxu1 %v1338_v10  ;;  %v1363_v53 = vld [vmem:[#allocation7 + $0x50] sm:$0xff]  }
  0x75   :  { %751 = vmatpush1.bf16.msra.mxu0 %v1265_v54  ;;  %708 = vmatpush1.bf16.msra.mxu1 %v1340_v12  ;;  %v1364_v54 = vld [vmem:[#allocation7 + $0x10] sm:$0xff]   ;;  %v173_v12 = vld [vmem:[%s1572_s2] sm:$0x3] }
  0x76   :  { %761 = vmatprep.subr.bf16.mxu0 %v1271_v58  ;;  %709 = vmatprep.subr.bf16.mxu1 %v1344_v14  ;;  %v1368_v58 = vld [vmem:[#allocation7 + $0x20] sm:$0xff]  }
  0x78   :  { %753 = vmatmul.mubr.bf16.vlgmr.msra.gmra.mrb[0].mxu0 %v70_v59  ;;  %v1369_v59 = vld [vmem:[#allocation7 + $0x68] sm:$0xff]  }
  0x79   :  { %762 = vmatpush1.bf16.msra.mxu0 %v1269_v62  ;;  %793 = vmatprep.mubr.bf16.mxu0 %v73_v7  ;;  %v1372_v62 = vld [vmem:[#allocation7 + $0x30] sm:$0xff]  }
  0x7a   :  { %763 = vmatprep.subr.bf16.mxu0 %v1277_v1  ;;  %710 = vmatpush1.bf16.msra.mxu1 %v1346_v16 }
  0x7b   :  { %802 = vmatprep.subr.bf16.mxu1 %v1355_v19 }
  0x7d   :  { %764 = vmatpush1.bf16.msra.mxu0 %v1275_v4  ;;  %712 = vmatmul.mubr.bf16.vlgmr.msra.gmra.mrb[0].mxu1 %v68_v21 }
  0x7e   :  { %765 = vmatprep.subr.bf16.mxu0 %v1283_v5  ;;  %803 = vmatpush1.bf16.msra.mxu1 %v1353_v22 }
  0x7f   :  { %834 = vmatprep.mubr.bf16.mxu1 %v1484_v25  ;;  %1171 = vmatprep.subr.bf16.mxu1 %v1359_v49 }
  0x81   :  { %766 = vmatpush1.bf16.msra.mxu0 %v1281_v9  ;;  %v175_v9 = vlaneseq }
  0x82   :  { %767 = vmatprep.subr.bf16.mxu0 %v1289_v11 }
  0x83   :  { %v176_v10 = vshrl.u32 %v175_v9, 7 }
  0x85   :  { %768 = vmatpush1.bf16.msra.mxu0 %v1287_v13  ;;  %1153 = vmatmul.mubr.msk.bf16.vlgmr.msra.gmra.mrb[4].mxu1 %vm675_vm0, %v74_v29  ;;  %v177_v11 = vsub.s32 0, %v176_v10  ;;  %v181_v13 = vsub.s32 1, %v176_v10 }
  0x86   :  { %769 = vmatprep.subr.bf16.mxu0 %v1295_v15  ;;  %1172 = vmatpush3.bf16.msra.mxu1 %v1360_v50 }
  0x87   :  { %1173 = vmatprep.subr.bf16.mxu1 %v1361_v51  ;;  %v178_v14 = vrot.slane %v173_v12, %v177_v11  ;;  %v182_v15 = vrot.slane %v173_v12, %v181_v13 }
  0x89   :  { %770 = vmatpush1.bf16.msra.mxu0 %v1293_v18 }
  0x8a   :  { %771 = vmatprep.subr.bf16.mxu0 %v1301_v20  ;;  %1174 = vmatpush3.bf16.msra.mxu1 %v1362_v52 }
  0x8b   :  { %1175 = vmatprep.subr.bf16.mxu1 %v1363_v53 }
  0x8d   :  { %772 = vmatpush1.bf16.msra.mxu0 %v1299_v23 }
  0x8e   :  { %773 = vmatprep.subr.bf16.mxu0 %v1307_v24  ;;  %1176 = vmatpush3.bf16.msra.mxu1 %v1364_v54 }
  0x8f   :  { %1177 = vmatprep.subr.bf16.mxu1 %v1365_v55 }
  0x91   :  { %774 = vmatpush1.bf16.msra.mxu0 %v1305_v27 }
  0x92   :  { %775 = vmatprep.subr.bf16.mxu0 %v1313_v28  ;;  %1178 = vmatpush3.bf16.msra.mxu1 %v1366_v56 }
  0x93   :  { %1179 = vmatprep.subr.bf16.mxu1 %v1367_v57 }
  0x95   :  { %776 = vmatpush1.bf16.msra.mxu0 %v1311_v30 }
  0x96   :  { %777 = vmatprep.subr.bf16.mxu0 %v1319_v31  ;;  %1180 = vmatpush3.bf16.msra.mxu1 %v1368_v58 }
  0x97   :  { %1181 = vmatprep.subr.bf16.mxu1 %v1369_v59 }
  0x99   :  { %778 = vmatpush1.bf16.msra.mxu0 %v1317_v32 }
  0x9a   :  { %779 = vmatprep.subr.bf16.mxu0 %v1325_v33  ;;  %1182 = vmatpush3.bf16.msra.mxu1 %v1370_v60 }
  0x9b   :  { %1183 = vmatprep.subr.bf16.mxu1 %v1371_v61 }
  0x9d   :  { %780 = vmatpush1.bf16.msra.mxu0 %v1323_v34 }
  0x9e   :  { %781 = vmatprep.subr.bf16.mxu0 %v1331_v35  ;;  %1184 = vmatpush3.bf16.msra.mxu1 %v1372_v62 }
  0x9f   :  { %1185 = vmatprep.subr.bf16.mxu1 %v1373_v63 }
  0xa1   :  { %782 = vmatpush1.bf16.msra.mxu0 %v1329_v36 }
  0xa2   :  { %783 = vmatprep.subr.bf16.mxu0 %v1337_v37  ;;  %1186 = vmatpush3.bf16.msra.mxu1 %v1374_v0 }
  0xa5   :  { %784 = vmatpush1.bf16.msra.mxu0 %v1335_v38  ;;  %v1154_v38 = vld [vmem:[%s1574_s4] ss:$0 sm:$0xff]  ;;  %s1449_s4 = scalar_lea.vmem %s1046_s9, 64 }
  0xa6   :  { %785 = vmatprep.subr.bf16.mxu0 %v1343_v39  ;;  %p1450_p10 = scmp.ne.s32.totalorder %s1046_s9, %s1449_s4  ;;  %p1455_p12 = scmp.lt.s32.totalorder %s1449_s4, %s1449_s4 }
  0xa8   :  { %p1456_p13 = por %p1455_p12, %p1454_p11 }
  0xa9   :  { %786 = vmatpush1.bf16.msra.mxu0 %v1341_v40 }
  0xaa   :  { %787 = vmatprep.subr.bf16.mxu0 %v1349_v41  ;;  %p1457_p0 = pnand %p1456_p13, %p1450_p10 }
  0xad   :  { %788 = vmatpush1.bf16.msra.mxu0 %v1347_v42 }
  0xae   :  { %789 = vmatprep.subr.bf16.mxu0 %v1352_v43 }
  0xb1   :  { %790 = vmatpush1.bf16.msra.mxu0 %v1350_v44 }
  0xb2   :  { %791 = vmatprep.subr.bf16.mxu0 %v1358_v45 }
  0xb5   :  { %792 = vmatpush1.bf16.msra.mxu0 %v1356_v46 }
  0xb8   :  { %794 = vmatmul.mubr.bf16.vlgmr.msra.gmra.mrb[0].mxu0 %v72_v48 }
 0x150   :  { %v713_v1 = vpop.f32.mrb[0].mxu1 }
 0x151   :  { %v715_v2 = vpop.f32.mrb[1].mxu1  ;;  %v714_v16 = vadd.f32 %v713_v1, %v178_v14 }
 0x152   :  { %v717_v3 = vpop.f32.mrb[2].mxu1  ;;  %v716_v17 = vadd.f32 %v715_v2, %v182_v15 }
 0x153   :  { %v718_v4 = vpop.f32.mrb[3].mxu1 }
 0x158   :  { %v836_v5 = vpop.f32.mrb[4].mxu1 }
 0x159   :  { %v838_v6 = vpop.f32.mrb[5].mxu1 }
 0x15a   :  { %v840_v7 = vpop.f32.mrb[6].mxu1 }
 0x15b   :  { %v841_v8 = vpop.f32.mrb[7].mxu1 }
 0x18b   :  { %v795_v18 = vpop.f32.mrb[0].mxu0 }
 0x18c   :  { %v1194_v19 = vadd.f32 %v795_v18, %v714_v16  ;;  %v797_v20 = vpop.f32.mrb[1].mxu0 }
 0x18d   :  { %v1197_v21 = vadd.f32 %v797_v20, %v716_v17  ;;  %v799_v22 = vpop.f32.mrb[2].mxu0 }
 0x18e   :  { %v1195_v23 = vadd.f32 %v1194_v19, %v836_v5  ;;  %v800_v24 = vpop.f32.mrb[3].mxu0 }
 0x18f   :  { %v1198_v25 = vadd.f32 %v1197_v21, %v838_v6 }
 0x190   :  { %v843_v26 = vmul.f32 0.5, %v1195_v23 }
 0x191   :  { %v844_v27 = vmul.f32 0.5, %v1198_v25 }
 0x192   :  { %1375 = vtanh.f32 %v843_v26 }
 0x193   :  { %1377 = vtanh.f32 %v844_v27 }
 0x19c   :  { %v1376_v28 = vpop.eup %1375 }
 0x19d   :  { %v1378_v29 = vpop.eup %1377  ;;  %v847_v30 = vadd.f32 1.0, %v1376_v28 }
 0x19e   :  { %v848_v31 = vadd.f32 1.0, %v1378_v29 }
 0x19f   :  { %v849_v32 = vmul.f32 0.5, %v847_v30 }
 0x1a0   :  { %v850_v33 = vmul.f32 0.5, %v848_v31 }
 0x1a1   :  { %v851_v35 = vpack.c.bf16 %v849_v32, %v849_v32 }
 0x1a2   :  { %v852_v34 = vpack.c.bf16 %v850_v33, %v850_v33 }
 0x1a4   :  { %1020 = vmatprep.mubr.bf16.mxu1 %v852_v34 }
 0x1a5   :  { %1021 = vmatmul.mubr.bf16.vlgmr.msra.gmra.mrb[8].mxu1 %v851_v35 }
 0x278   :  { %v1187_v36 = vpop.f32.mrb[8].mxu1 }
 0x279   :  { %v1188_v37 = vpop.f32.mrb[9].mxu1 }
 0x27a   :  { %v1189_v39 = vadd.f32 %v1188_v37, %v1187_v36  ;;  %v1190_v40 = vpop.f32.mrb[10].mxu1 }
 0x27b   :  { %v1191_v41 = vpop.f32.mrb[11].mxu1 }
 0x27c   :  { %v1023_v42 = vadd.f32 %v1189_v39, %v1154_v38 }
 0x27e   :  { %1028 = vmax.xlane.f32.xlu0 %v1023_v42 }
 0x30b   :  { %v1029_v43 = vpop.xlane.xlu0 %1028 }
 0x30c   :  { %v1030_v44 = vsub.f32 %v1023_v42, %v1029_v43 }
 0x30e   :  { %v1031_v45 = vmul.f32 1.442695, %v1030_v44 }
 0x310   :  { %1379 = vpow2.f32 %v1031_v45 }
 0x31a   :  { %v1380_v46 = vpop.eup %1379 }
 0x31b   :  { %1033 = vadd.xlane.f32.xlu0 %v1380_v46 }
 0x3a8   :  { %v1034_v47 = vpop.xlane.xlu0 %1033 }
 0x3a9   :  { %1381 = vrcp.f32 %v1034_v47 }
 0x3b3   :  { %v1382_v48 = vpop.eup %1381 }
 0x3b4   :  { %v1036_v49 = vmul.f32 %v1382_v48, %v1380_v46 }
 0x3b6   :  { %v1037_v50 = vpack.c.bf16 %v1036_v49, %v1036_v49 }
 0x3b8   :  { %1038 = vst [vmem:[#allocation8] sm:$0xf] %v1037_v50 }
 0x3b9   :  { %1460 = shalt.err (!%p1457_p0)
}
 0x3ba   :  { %s1461_s12 = scalar_lea.hbm %s1575_s5, 64 }
 0x3bb   :  { %p1462_p1 = scmp.ne.s32.totalorder %s1575_s5, %s1461_s12  ;;  %p1465_p2 = scmp.lt.u32.totalorder %s1461_s12, %s1575_s5 }
 0x3bd   :  { %p1467_p3 = pnand %p1465_p2, %p1462_p1 }
 0x3bf   :  { %1470 = shalt.err (!%p1467_p3)
}
 0x3c0   :  { %1048 = dma.vmem_to_hbm [thread:$0]  %s1046_s9, 64, %s1575_s5, [#allocation4]  }
 0x3c1   :  { %1475 = dma.done.wait [#allocation4], 64  }
 0x3c2   :  { %1476 = vsyncadd [#allocation4], 4294967232 }
 0x3c3   :  { %1052 = vsyncpa [#allocation3], 1 }
 0x3c4   :  { %1053 = vsyncpa [#allocation6], 1 }
 0x3c5   :  { %1054 = vsyncpa [#allocation4], 1 }

</bundles_post_ra>
